<compile_context>
chip_gen: v7x
topology: tpu7x:2x2x1
jax: 0.10.0
libtpu: 0.0.40
codegen_flags: <defaults>
</compile_context>

<pallas_src>
import functools

import jax
import jax.numpy as jnp
from jax.experimental import pallas as pl
from jax.experimental.pallas import tpu as pltpu


def _round_up(x, m):
    return (x + m - 1) // m * m


def _pick_tile(dim, candidates):
    for c in candidates:
        if dim % c == 0:
            return c
    return dim  # fall back to the full (untiled) dimension


_VMEM_LIMIT = 32 * 1024 * 1024  # safe on v5e/v6e (128 MiB) and v7x (64 MiB physical)


# ----------------------------------------------------------------------------
# Pallas kernels
# ----------------------------------------------------------------------------
def _matmul_bn_kernel(a_ref, b_ref, scale_ref, bias_ref, o_ref, *, relu):
    # Single-shot K: the whole reduction runs inside one MXU dot (K <= 4608 for every
    # matmul in this network), accumulating in f32.  Epilogue fuses folded-BN + ReLU.
    acc = jnp.dot(a_ref[...], b_ref[...], preferred_element_type=jnp.float32)
    y = acc * scale_ref[...] + bias_ref[...]
    if relu:
        y = jnp.maximum(y, 0.0)
    o_ref[...] = y.astype(o_ref.dtype)


def _matmul_bn_res_kernel(a_ref, b_ref, scale_ref, bias_ref, res_ref, o_ref, *, relu):
    acc = jnp.dot(a_ref[...], b_ref[...], preferred_element_type=jnp.float32)
    y = acc * scale_ref[...] + bias_ref[...] + res_ref[...].astype(jnp.float32)
    if relu:
        y = jnp.maximum(y, 0.0)
    o_ref[...] = y.astype(o_ref.dtype)


def _avgpool_kernel(x_ref, o_ref):
    # x_ref: (N, H*W, tc) -> o_ref: (N, tc); reduce the spatial (sublane) axis in f32.
    o_ref[...] = jnp.mean(x_ref[...].astype(jnp.float32), axis=1)


# ----------------------------------------------------------------------------
# Pallas wrappers
# ----------------------------------------------------------------------------
def matmul_bn_act(a, b, scale, bias, residual=None, relu=True, out_dtype=jnp.bfloat16):
    """y = act((a @ b) * scale + bias [+ residual]).

    a: (M, K) float (cast to bf16), b: (K, N) bf16, scale/bias: (1, N) f32,
    residual: (M, N) or None.  Returns (M, N) in out_dtype.
    """
    M, K = a.shape
    K2, N = b.shape
    assert K == K2
    a = a.astype(jnp.bfloat16)
    b = b.astype(jnp.bfloat16)

    Mp = _round_up(M, 8)
    if Mp != M:  # only the tiny FC head (M = batch) ever hits this branch
        a = jnp.zeros((Mp, K), a.dtype).at[:M].set(a)
        if residual is not None:
            residual = jnp.zeros((Mp, N), jnp.bfloat16).at[:M].set(
                residual.astype(jnp.bfloat16))

    tm = _pick_tile(Mp, (256, 128, 64, 32, 16, 8))
    tn = _pick_tile(N, (256, 128))
    grid = (Mp // tm, N // tn)

    in_specs = [
        pl.BlockSpec((tm, K), lambda i, j: (i, 0)),    # A: full-K slab per M tile
        pl.BlockSpec((K, tn), lambda i, j: (0, j)),    # B: full-K slab per N tile
        pl.BlockSpec((1, tn), lambda i, j: (0, j)),    # folded-BN scale
        pl.BlockSpec((1, tn), lambda i, j: (0, j)),    # folded-BN bias
    ]
    args = [a, b, scale, bias]

    if residual is not None:
        in_specs.append(pl.BlockSpec((tm, tn), lambda i, j: (i, j)))
        args.append(residual.astype(jnp.bfloat16))
        kernel = functools.partial(_matmul_bn_res_kernel, relu=relu)
    else:
        kernel = functools.partial(_matmul_bn_kernel, relu=relu)

    out = pl.pallas_call(
        kernel,
        out_shape=jax.ShapeDtypeStruct((Mp, N), out_dtype),
        grid_spec=pltpu.PrefetchScalarGridSpec(
            num_scalar_prefetch=0,
            grid=grid,
            in_specs=in_specs,
            out_specs=pl.BlockSpec((tm, tn), lambda i, j: (i, j)),
        ),
        compiler_params=pltpu.CompilerParams(
            dimension_semantics=("parallel", "parallel"),
            vmem_limit_bytes=_VMEM_LIMIT,
        ),
    )(*args)
    if Mp != M:
        out = out[:M]
    return out


def global_avg_pool(x):
    """x: (N, H, W, C) bf16 -> (N, C) f32, mean over spatial dims (tiled over channels)."""
    n, h, w, c = x.shape
    x2 = x.reshape(n, h * w, c)
    tc = _pick_tile(c, (512, 256, 128))
    return pl.pallas_call(
        _avgpool_kernel,
        out_shape=jax.ShapeDtypeStruct((n, c), jnp.float32),
        grid_spec=pltpu.PrefetchScalarGridSpec(
            num_scalar_prefetch=0,
            grid=(c // tc,),
            in_specs=[pl.BlockSpec((n, h * w, tc), lambda j: (0, 0, j))],
            out_specs=pl.BlockSpec((n, tc), lambda j: (0, j)),
        ),
        compiler_params=pltpu.CompilerParams(
            dimension_semantics=("parallel",),
            vmem_limit_bytes=_VMEM_LIMIT,
        ),
    )(x2)


# ----------------------------------------------------------------------------
# Conv = im2col (bf16 glue) + Pallas fused matmul
# ----------------------------------------------------------------------------
def im2col(x, ksize, stride, padding):
    n, h, w, c = x.shape
    ho = (h + 2 * padding - ksize) // stride + 1
    wo = (w + 2 * padding - ksize) // stride + 1
    xp = jnp.pad(x, ((0, 0), (padding, padding), (padding, padding), (0, 0)))
    cols = []
    for i in range(ksize):
        for j in range(ksize):
            cols.append(xp[:, i:i + stride * ho:stride, j:j + stride * wo:stride, :])
    patches = jnp.concatenate(cols, axis=-1)  # (n, ho, wo, ksize*ksize*c), bf16
    return patches.reshape(n * ho * wo, ksize * ksize * c), ho, wo


def conv_bn_act(x, w, scale, bias, stride=1, padding=0, relu=True, residual=None):
    """x: (N,H,W,Cin) bf16, w: (kh,kw,Cin,Cout) bf16. Conv (no bias) + folded-BN
    (+ residual) + ReLU, all fused in the matmul epilogue."""
    n = x.shape[0]
    kh, kw, cin, cout = w.shape
    if kh == 1 and kw == 1 and padding == 0:
        if stride > 1:
            x = x[:, ::stride, ::stride, :]
        ho, wo = x.shape[1], x.shape[2]
        a = x.reshape(n * ho * wo, cin)
    else:
        a, ho, wo = im2col(x, kh, stride, padding)
    b = w.reshape(kh * kw * cin, cout)
    res_mat = None if residual is None else residual.reshape(n * ho * wo, cout)
    y = matmul_bn_act(a, b, scale, bias, residual=res_mat, relu=relu)
    return y.reshape(n, ho, wo, cout)


# ----------------------------------------------------------------------------
# ResNet50s parameters (deterministic, synthetic) and forward pass
# ----------------------------------------------------------------------------
def make_params(key, num_classes=10):
    eps = 1e-5
    bn_scale_val = 1.0 / jnp.sqrt(jnp.float32(1.0 + eps))  # gamma=1, running_var=1
    keys = iter(jax.random.split(key, 256))

    def conv_param(k, kh, kw, cin, cout):
        w = (jax.random.normal(k, (kh, kw, cin, cout), jnp.float32) * 0.02)
        return {
            "w": w.astype(jnp.bfloat16),                            # pre-cast to bf16
            "scale": jnp.full((1, cout), bn_scale_val, jnp.float32),  # folded BN scale
            "bias": jnp.zeros((1, cout), jnp.float32),                # folded BN bias
        }

    params = {"conv1": conv_param(next(keys), 3, 3, 3, 64)}

    layers_cfg = [(64, 3, 1), (128, 4, 2), (256, 6, 2), (512, 3, 2)]
    in_ch = 64
    layers = []
    for planes, blocks, stride in layers_cfg:
        blk_list = []
        for bi in range(blocks):
            s = stride if bi == 0 else 1
            blk = {
                "stride": s,
                "conv1": conv_param(next(keys), 1, 1, in_ch, planes),
                "conv2": conv_param(next(keys), 3, 3, planes, planes),
                "conv3": conv_param(next(keys), 1, 1, planes, planes * 4),
            }
            if bi == 0:  # resnet50: first block of every layer has a projection shortcut
                blk["downsample"] = conv_param(next(keys), 1, 1, in_ch, planes * 4)
            blk_list.append(blk)
            in_ch = planes * 4
        layers.append(blk_list)
    params["layers"] = layers

    params["fc_w"] = (jax.random.normal(next(keys), (2048, num_classes), jnp.float32)
                      * 0.02).astype(jnp.bfloat16)
    params["fc_scale"] = jnp.ones((1, num_classes), jnp.float32)   # no BN on the head
    params["fc_bias"] = jnp.zeros((1, num_classes), jnp.float32)
    return params


def bottleneck(x, blk):
    s = blk["stride"]
    if "downsample" in blk:
        d = blk["downsample"]
        identity = conv_bn_act(x, d["w"], d["scale"], d["bias"],
                               stride=s, padding=0, relu=False)
    else:
        identity = x
    out = conv_bn_act(x, blk["conv1"]["w"], blk["conv1"]["scale"], blk["conv1"]["bias"],
                      stride=1, padding=0, relu=True)
    out = conv_bn_act(out, blk["conv2"]["w"], blk["conv2"]["scale"], blk["conv2"]["bias"],
                      stride=s, padding=1, relu=True)
    # conv3 + BN, then residual add and final ReLU fused in the matmul epilogue
    out = conv_bn_act(out, blk["conv3"]["w"], blk["conv3"]["scale"], blk["conv3"]["bias"],
                      stride=1, padding=0, relu=True, residual=identity)
    return out


def resnet50s_forward(params, x_nchw):
    x = jnp.transpose(x_nchw, (0, 2, 3, 1)).astype(jnp.bfloat16)  # NCHW f32 -> NHWC bf16
    c1 = params["conv1"]
    x = conv_bn_act(x, c1["w"], c1["scale"], c1["bias"], stride=1, padding=1, relu=True)
    # maxpool is nn.Identity()
    for layer in params["layers"]:
        for blk in layer:
            x = bottleneck(x, blk)
    feats = global_avg_pool(x)  # (N, 2048) f32 == torch.flatten(avgpool(x), 1)
    logits = matmul_bn_act(feats, params["fc_w"], params["fc_scale"], params["fc_bias"],
                           relu=False, out_dtype=jnp.float32)
    return logits


if __name__ == "__main__":
    key = jax.random.PRNGKey(0)
    pkey, xkey = jax.random.split(key)
    params = make_params(pkey, num_classes=10)
    # Small CIFAR-like input, NCHW exactly as the PyTorch module expects.
    x = jax.random.normal(xkey, (2, 3, 16, 16), jnp.float32)
    logits = resnet50s_forward(params, x)
    logits = jax.block_until_ready(logits)
    assert logits.shape == (2, 10), logits.shape
    assert bool(jnp.all(jnp.isfinite(logits)))
    print("KERNEL_OK")
</pallas_src>

<mosaic_0001>
module attributes {stable_mosaic.version = 11 : i64} {
  func.func @_matmul_bn_kernel(%arg0: i32, %arg1: i32, %arg2: memref<256x27xbf16, #tpu.memory_space<vmem>>, %arg3: memref<27x64xbf16, #tpu.memory_space<vmem>>, %arg4: memref<1x64xf32, #tpu.memory_space<vmem>>, %arg5: memref<1x64xf32, #tpu.memory_space<vmem>>, %arg6: memref<256x64xbf16, #tpu.memory_space<vmem>>) attributes {dimension_semantics = [#tpu.dimension_semantics<parallel>, #tpu.dimension_semantics<parallel>], iteration_bounds = array<i64: 2, 1>, scalar_prefetch = 0 : i64, scratch_operands = 0 : i64, tpu.core_type = #tpu.core_type<tc>, window_params = [{transform_indices = @transform_0, window_bounds = array<i64: 256, 27>}, {transform_indices = @transform_1, window_bounds = array<i64: 27, 64>}, {transform_indices = @transform_2, window_bounds = array<i64: 1, 64>}, {transform_indices = @transform_3, window_bounds = array<i64: 1, 64>}, {transform_indices = @transform_4, window_bounds = array<i64: 256, 64>}]} {
    %c0 = arith.constant 0 : index
    %c0_0 = arith.constant 0 : index
    %0 = vector.load %arg2[%c0, %c0_0] : memref<256x27xbf16, #tpu.memory_space<vmem>>, vector<256x27xbf16>
    %c0_1 = arith.constant 0 : index
    %c0_2 = arith.constant 0 : index
    %1 = vector.load %arg3[%c0_1, %c0_2] : memref<27x64xbf16, #tpu.memory_space<vmem>>, vector<27x64xbf16>
    %cst = arith.constant dense<0.000000e+00> : vector<256x64xf32>
    %2 = tpu.matmul %0, %1, %cst {dimension_numbers = #tpu.dot_dimension_numbers<[1], [0], [0], [1], [0, 0, 1, 1], [], []>} : vector<256x27xbf16>, vector<27x64xbf16>, vector<256x64xf32> -> vector<256x64xf32>
    %c0_3 = arith.constant 0 : index
    %c0_4 = arith.constant 0 : index
    %3 = vector.load %arg4[%c0_3, %c0_4] : memref<1x64xf32, #tpu.memory_space<vmem>>, vector<1x64xf32>
    %4 = vector.broadcast %3 : vector<1x64xf32> to vector<256x64xf32>
    %5 = arith.mulf %2, %4 : vector<256x64xf32>
    %c0_5 = arith.constant 0 : index
    %c0_6 = arith.constant 0 : index
    %6 = vector.load %arg5[%c0_5, %c0_6] : memref<1x64xf32, #tpu.memory_space<vmem>>, vector<1x64xf32>
    %7 = vector.broadcast %6 : vector<1x64xf32> to vector<256x64xf32>
    %8 = arith.addf %5, %7 : vector<256x64xf32>
    %cst_7 = arith.constant 0.000000e+00 : f32
    %9 = vector.broadcast %cst_7 : f32 to vector<256x64xf32>
    %10 = arith.maximumf %8, %9 : vector<256x64xf32>
    %11 = arith.truncf %10 : vector<256x64xf32> to vector<256x64xbf16>
    %c0_8 = arith.constant 0 : index
    %c0_9 = arith.constant 0 : index
    %12 = vector.load %arg6[%c0_8, %c0_9] : memref<256x64xbf16, #tpu.memory_space<vmem>>, vector<256x64xbf16>
    tpu.vector_store %arg6[%c0_8, %c0_9], %11 {strides = array<i32>} : memref<256x64xbf16, #tpu.memory_space<vmem>>, vector<256x64xbf16>,
    return
  }
  func.func @transform_0(%arg0: i32, %arg1: i32) -> (i32, i32) {
    %c0_i32 = arith.constant 0 : i32
    %c0_i32_0 = arith.constant 0 : i32
    return %arg0, %c0_i32 : i32, i32
  }
  func.func @transform_1(%arg0: i32, %arg1: i32) -> (i32, i32) {
    %c0_i32 = arith.constant 0 : i32
    %c0_i32_0 = arith.constant 0 : i32
    return %c0_i32, %arg1 : i32, i32
  }
  func.func @transform_2(%arg0: i32, %arg1: i32) -> (i32, i32) {
    %c0_i32 = arith.constant 0 : i32
    %c0_i32_0 = arith.constant 0 : i32
    return %c0_i32, %arg1 : i32, i32
  }
  func.func @transform_3(%arg0: i32, %arg1: i32) -> (i32, i32) {
    %c0_i32 = arith.constant 0 : i32
    %c0_i32_0 = arith.constant 0 : i32
    return %c0_i32, %arg1 : i32, i32
  }
  func.func @transform_4(%arg0: i32, %arg1: i32) -> (i32, i32) {
    %c0_i32 = arith.constant 0 : i32
    return %arg0, %arg1 : i32, i32
  }
}

</mosaic_0001>

<bundles_post_ra>
// kernel: tpu_custom_call.1
= control target key start
LH: loop header
LB: loop body
LE: loop exit
PB: predicated region body
PF: predicated region fallthrough
CT: control target
= control target key end

     0   :  { %s1261_s15 = smov 0   ;;  %s1263_s16 = smov 0   ;;  %s1481_s0 = inlined_call_operand.vmem [shape: bf16[512,27], index: 0, kind: input, shape index: {}]   ;;  %s1482_s1 = inlined_call_operand.vmem [shape: bf16[27,64], index: 1, kind: input, shape index: {}]   ;;  %s1483_s2 = inlined_call_operand.vmem [shape: f32[1,64], index: 2, kind: input, shape index: {}]   ;;  %s1484_s3 = inlined_call_operand.vmem [shape: f32[1,64], index: 3, kind: input, shape index: {}]   ;;  %s1485_s4 = inlined_call_operand.vmem [shape: bf16[512,64], index: 4, kind: output, shape index: {}]  }
   0x1   :  { %s1265_s17 = smov 0  }
   0x2 LB: > { %s26_s18 = sadd.s32 1, %s1229_s16  ;;  %p1003_p0 = scmp.ge.s32.totalorder %s1233_s17, 1  ;;  %s1233_s17 = sphi %s1265_s17, %s14_s17   ;;  %s1229_s16 = sphi %s1263_s16, %s1487_s16   ;;  %s1225_s15 = sphi %s1261_s15, %s1486_s15  }
   0x3   : > { %p28_p1 = scmp.ge.s32.totalorder %s26_s18, 2  ;;  %p202_p2 = scmp.lt.s32.totalorder %s1233_s17, 3 }
   0x5   : > { %s1489_s18 = smov (%p28_p1, %s26_s18), 0  ;;  %p203_p3 = pnand %p1003_p0, %p202_p2 }
   0x6   : > { %v1193_v0 = vld [vmem:[%s1482_s1] sm:$0xff] (!%p203_p3)   ;;  %vm443_vm0 = vcmask (!%p203_p3), 1044480   ;;  %v1194_v1 = vld [vmem:[%s1482_s1 + $0x8] sm:$0x3f] (!%p203_p3)   ;;  %vm444_vm1 = vcmask (!%p203_p3), 1045504   ;;  %s1004_s23 = sshll.u32 (!%p203_p3), %s1225_s15, 5 }
   0x7   : > { %206 = sbr.rel (%p203_p3) target bundleno = 270 (0x10e), region = 36  ;;  %1128 = vmatprep.subr.bf16.mxu0 (!%p203_p3), %v1193_v0  ;;  %1164 = vmatprep.subr.bf16.mxu1 (!%p203_p3), %v1193_v0  ;;  %v1235_v2 = vmov (!%p203_p3), 65535   ;;  %p242_p4 = scmp.lt.s32.totalorder (!%p203_p3), %s1004_s23, 63  ;;  %vm394_vm2 = vcmask (!%p203_p3), 220160   ;;  %v1330_v22 = vld [vmem:[%s1483_s2] ss:$0 sm:$0xff] (!%p203_p3) }
   0x8   : > { %1129 = vmatpush3.bf16.msra.mxu0 (!%p203_p3), %v1193_v0  ;;  %1166 = vmatpush3.bf16.msra.mxu1 (!%p203_p3), %v1193_v0  ;;  %v445_v3 = vsel (!%p203_p3), %vm443_vm0, 4294967295, %v1235_v2  ;;  %v1335_v24 = vld [vmem:[%s1484_s3] ss:$0 sm:$0xff] (!%p203_p3)  ;;  %vm849_vm3 = vcmask (!%p203_p3), 519168  }
   0x9   : > { %v446_v4 = vsel (!%p203_p3), %vm444_vm1, %v445_v3, 0 }
   0xa   : > { %v448_v5 = vand.u32 (!%p203_p3), %v1194_v1, %v446_v4 }
   0xc   : > { %1130 = vmatprep.subr.bf16.mxu0 (!%p203_p3), %v448_v5  ;;  %1165 = vmatprep.subr.bf16.mxu1 (!%p203_p3), %v448_v5 }
   0xd   : > { %1131 = vmatpush3.bf16.msra.mxu0 (!%p203_p3), %v448_v5  ;;  %1167 = vmatpush3.bf16.msra.mxu1 (!%p203_p3), %v448_v5 }
   0xe   : > { %s1491_s23 = smov (!%p242_p4, %s1004_s23), 63 }
   0xf   : > { %s1005_s24 = sshll.u32 %s1491_s23, 2 }
  0x10   : > { %s1293_s27 = scalar_lea.vmem %s1481_s0, %s1005_s24  ;;  %s1355_s8 = scalar_lea.vmem %s1485_s4, %s1005_s24 }
  0x11   : > { %v1195_v6 = vld [vmem:[%s1293_s27] sm:$0xff]   ;;  %v1197_v8 = vld [vmem:[%s1293_s27 + $0x8] sm:$0xff]   ;;  %v1199_v10 = vld [vmem:[%s1293_s27 + $0x10] sm:$0xff]  }
  0x12   : > { %v1196_v7 = vld [vmem:[%s1293_s27 + $0x40] sm:$0xff]   ;;  %1132 = vmatprep.mubr.msk.bf16.mxu0 %vm394_vm2, %v1195_v6  ;;  %v1198_v9 = vld [vmem:[%s1293_s27 + $0x48] sm:$0xff]   ;;  %v1200_v11 = vld [vmem:[%s1293_s27 + $0x50] sm:$0xff]  }
  0x13   : > { %1148 = vmatprep.mubr.msk.bf16.mxu1 %vm394_vm2, %v1196_v7  ;;  %1133 = vmatmul.mubr.msk.bf16.vlgmr.msra.gmra.mrb[0].mxu0 %vm394_vm2, %v1197_v8  ;;  %v1201_v12 = vld [vmem:[%s1293_s27 + $0x18] sm:$0xff]   ;;  %v1203_v14 = vld [vmem:[%s1293_s27 + $0x20] sm:$0xff]   ;;  %v1205_v16 = vld [vmem:[%s1293_s27 + $0x28] sm:$0xff]  }
  0x14   : > { %1149 = vmatmul.mubr.msk.bf16.vlgmr.msra.gmra.mrb[0].mxu1 %vm394_vm2, %v1198_v9  ;;  %1136 = vmatprep.mubr.msk.bf16.mxu0 %vm394_vm2, %v1199_v10  ;;  %v1202_v13 = vld [vmem:[%s1293_s27 + $0x58] sm:$0xff]   ;;  %v1204_v15 = vld [vmem:[%s1293_s27 + $0x60] sm:$0xff]   ;;  %v1206_v17 = vld [vmem:[%s1293_s27 + $0x68] sm:$0xff]  }
  0x15   : > { %1152 = vmatprep.mubr.msk.bf16.mxu1 %vm394_vm2, %v1200_v11  ;;  %v1207_v18 = vld [vmem:[%s1293_s27 + $0x30] sm:$0xff]   ;;  %v1209_v20 = vld [vmem:[%s1293_s27 + $0x38] sm:$0xff]  }
  0x16   : > { %v1208_v19 = vld [vmem:[%s1293_s27 + $0x70] sm:$0xff]   ;;  %v1210_v21 = vld [vmem:[%s1293_s27 + $0x78] sm:$0xff]  }
  0x1b   : > { %1137 = vmatmul.mubr.msk.bf16.gmra.mrb[4].mxu0 %vm394_vm2, %v1201_v12 }
  0x1c   : > { %1153 = vmatmul.mubr.msk.bf16.gmra.mrb[4].mxu1 %vm394_vm2, %v1202_v13  ;;  %1140 = vmatprep.mubr.msk.bf16.mxu0 %vm394_vm2, %v1203_v14 }
  0x1d   : > { %1156 = vmatprep.mubr.msk.bf16.mxu1 %vm394_vm2, %v1204_v15 }
  0x23   : > { %1141 = vmatmul.mubr.msk.bf16.gmra.mrb[8].mxu0 %vm394_vm2, %v1205_v16 }
  0x24   : > { %1157 = vmatmul.mubr.msk.bf16.gmra.mrb[8].mxu1 %vm394_vm2, %v1206_v17  ;;  %1144 = vmatprep.mubr.msk.bf16.mxu0 %vm394_vm2, %v1207_v18 }
  0x25   : > { %1160 = vmatprep.mubr.msk.bf16.mxu1 %vm394_vm2, %v1208_v19 }
  0x2b   : > { %1145 = vmatmul.mubr.msk.bf16.gmra.mrb[12].mxu0 %vm394_vm2, %v1209_v20 }
  0x2c   : > { %1161 = vmatmul.mubr.msk.bf16.gmra.mrb[12].mxu1 %vm394_vm2, %v1210_v21 }
  0xe6   : > { %v1134_v23 = vpop.f32.mrb[0].mxu0 }
  0xe7   : > { %v620_v25 = vmul.f32 %v1134_v23, %v1330_v22  ;;  %v1150_v26 = vpop.f32.mrb[0].mxu1  ;;  %v484_v27 = vpop.f32.mrb[1].mxu0 }
  0xe8   : > { %v636_v28 = vmul.f32 %v1150_v26, %v1330_v22  ;;  %v618_v29 = vmul.f32 %v1330_v22, %v484_v27  ;;  %v548_v30 = vpop.f32.mrb[1].mxu1  ;;  %v1135_v31 = vpop.f32.mrb[2].mxu0 }
  0xe9   : > { %v659_v32 = vadd.f32 %v1335_v24, %v620_v25  ;;  %v634_v33 = vmul.f32 %v1330_v22, %v548_v30  ;;  %v621_v34 = vmul.f32 %v1135_v31, %v1330_v22  ;;  %v1151_v35 = vpop.f32.mrb[2].mxu1  ;;  %v487_v36 = vpop.f32.mrb[3].mxu0 }
  0xea   : > { %v675_v37 = vadd.f32 %v1335_v24, %v636_v28  ;;  %v657_v38 = vadd.f32 %v1335_v24, %v618_v29  ;;  %v637_v39 = vmul.f32 %v1151_v35, %v1330_v22  ;;  %v619_v40 = vmul.f32 %v1330_v22, %v487_v36  ;;  %v551_v41 = vpop.f32.mrb[3].mxu1 }
  0xeb   : > { %v691_v42 = vmax.f32 %v659_v32, 0.0  ;;  %v673_v43 = vadd.f32 %v1335_v24, %v634_v33  ;;  %v660_v44 = vadd.f32 %v1335_v24, %v621_v34  ;;  %v635_v45 = vmul.f32 %v1330_v22, %v551_v41 }
  0xec   : > { %v707_v46 = vmax.f32 %v675_v37, 0.0  ;;  %v689_v47 = vmax.f32 %v657_v38, 0.0  ;;  %v676_v48 = vadd.f32 %v1335_v24, %v637_v39  ;;  %v658_v49 = vadd.f32 %v1335_v24, %v619_v40 }
  0xed   : > { %v1080_v50 = vpack.c.bf16 %v691_v42, %v691_v42  ;;  %v705_v51 = vmax.f32 %v673_v43, 0.0  ;;  %v692_v52 = vmax.f32 %v660_v44, 0.0  ;;  %v674_v53 = vadd.f32 %v1335_v24, %v635_v45 }
  0xee   : > { %v1096_v54 = vpack.c.bf16 %v707_v46, %v707_v46  ;;  %v1078_v55 = vpack.c.bf16 %v689_v47, %v689_v47  ;;  %v708_v56 = vmax.f32 %v676_v48, 0.0  ;;  %v690_v57 = vmax.f32 %v658_v49, 0.0  ;;  %v1138_v58 = vpop.f32.mrb[4].mxu0 }
  0xef   : > { %852 = vst.msk [vmem:[%s1355_s8 + $0x8] sm:$0xf] %vm849_vm3, %v1080_v50  ;;  %v1094_v59 = vpack.c.bf16 %v705_v51, %v705_v51  ;;  %v1081_v60 = vpack.c.bf16 %v692_v52, %v692_v52  ;;  %v706_v61 = vmax.f32 %v674_v53, 0.0  ;;  %v624_v62 = vmul.f32 %v1138_v58, %v1330_v22  ;;  %v1154_v63 = vpop.f32.mrb[4].mxu1  ;;  %v500_v0 = vpop.f32.mrb[5].mxu0 }
  0xf0   : > { %868 = vst.msk [vmem:[%s1355_s8 + $0x48] sm:$0xf] %vm849_vm3, %v1096_v54  ;;  %850 = vst.msk [vmem:[%s1355_s8] sm:$0xf] %vm849_vm3, %v1078_v55  ;;  %v1097_v1 = vpack.c.bf16 %v708_v56, %v708_v56  ;;  %v1079_v2 = vpack.c.bf16 %v690_v57, %v690_v57  ;;  %v640_v3 = vmul.f32 %v1154_v63, %v1330_v22  ;;  %v564_v5 = vpop.f32.mrb[5].mxu1  ;;  %v1139_v6 = vpop.f32.mrb[6].mxu0 }
  0xf1   : > { %v622_v4 = vmul.f32 %v1330_v22, %v500_v0  ;;  %866 = vst.msk [vmem:[%s1355_s8 + $0x40] sm:$0xf] %vm849_vm3, %v1094_v59  ;;  %853 = vst.msk [vmem:[%s1355_s8 + $0xc] sm:$0xf] %vm849_vm3, %v1081_v60  ;;  %v1095_v7 = vpack.c.bf16 %v706_v61, %v706_v61  ;;  %v663_v8 = vadd.f32 %v1335_v24, %v624_v62  ;;  %v1155_v11 = vpop.f32.mrb[6].mxu1  ;;  %v503_v12 = vpop.f32.mrb[7].mxu0 }
  0xf2   : > { %v638_v9 = vmul.f32 %v1330_v22, %v564_v5  ;;  %v625_v10 = vmul.f32 %v1139_v6, %v1330_v22  ;;  %869 = vst.msk [vmem:[%s1355_s8 + $0x4c] sm:$0xf] %vm849_vm3, %v1097_v1  ;;  %851 = vst.msk [vmem:[%s1355_s8 + $0x4] sm:$0xf] %vm849_vm3, %v1079_v2  ;;  %v679_v13 = vadd.f32 %v1335_v24, %v640_v3  ;;  %v567_v17 = vpop.f32.mrb[7].mxu1 }
  0xf3   : > { %v661_v14 = vadd.f32 %v1335_v24, %v622_v4  ;;  %v641_v15 = vmul.f32 %v1155_v11, %v1330_v22  ;;  %v623_v16 = vmul.f32 %v1330_v22, %v503_v12  ;;  %867 = vst.msk [vmem:[%s1355_s8 + $0x44] sm:$0xf] %vm849_vm3, %v1095_v7  ;;  %v695_v18 = vmax.f32 %v663_v8, 0.0 }
  0xf4   : > { %v677_v19 = vadd.f32 %v1335_v24, %v638_v9  ;;  %v664_v20 = vadd.f32 %v1335_v24, %v625_v10  ;;  %v639_v21 = vmul.f32 %v1330_v22, %v567_v17  ;;  %v711_v23 = vmax.f32 %v679_v13, 0.0 }
  0xf5   : > { %v693_v25 = vmax.f32 %v661_v14, 0.0  ;;  %v680_v26 = vadd.f32 %v1335_v24, %v641_v15  ;;  %v662_v27 = vadd.f32 %v1335_v24, %v623_v16  ;;  %v1084_v28 = vpack.c.bf16 %v695_v18, %v695_v18 }
  0xf6   : > { %v709_v29 = vmax.f32 %v677_v19, 0.0  ;;  %v696_v30 = vmax.f32 %v664_v20, 0.0  ;;  %v678_v31 = vadd.f32 %v1335_v24, %v639_v21  ;;  %v1100_v32 = vpack.c.bf16 %v711_v23, %v711_v23  ;;  %v1142_v36 = vpop.f32.mrb[8].mxu0 }
  0xf7   : > { %v1082_v33 = vpack.c.bf16 %v693_v25, %v693_v25  ;;  %v712_v34 = vmax.f32 %v680_v26, 0.0  ;;  %v694_v35 = vmax.f32 %v662_v27, 0.0  ;;  %856 = vst.msk [vmem:[%s1355_s8 + $0x18] sm:$0xf] %vm849_vm3, %v1084_v28  ;;  %v628_v40 = vmul.f32 %v1142_v36, %v1330_v22  ;;  %v1158_v41 = vpop.f32.mrb[8].mxu1  ;;  %v516_v42 = vpop.f32.mrb[9].mxu0 }
  0xf8   : > { %v1098_v37 = vpack.c.bf16 %v709_v29, %v709_v29  ;;  %v1085_v38 = vpack.c.bf16 %v696_v30, %v696_v30  ;;  %v710_v39 = vmax.f32 %v678_v31, 0.0  ;;  %872 = vst.msk [vmem:[%s1355_s8 + $0x58] sm:$0xf] %vm849_vm3, %v1100_v32  ;;  %v644_v45 = vmul.f32 %v1158_v41, %v1330_v22  ;;  %v580_v47 = vpop.f32.mrb[9].mxu1  ;;  %v1143_v48 = vpop.f32.mrb[10].mxu0 }
  0xf9   : > { %854 = vst.msk [vmem:[%s1355_s8 + $0x10] sm:$0xf] %vm849_vm3, %v1082_v33  ;;  %v1101_v43 = vpack.c.bf16 %v712_v34, %v712_v34  ;;  %v1083_v44 = vpack.c.bf16 %v694_v35, %v694_v35  ;;  %v626_v46 = vmul.f32 %v1330_v22, %v516_v42  ;;  %v667_v50 = vadd.f32 %v1335_v24, %v628_v40  ;;  %v1159_v53 = vpop.f32.mrb[10].mxu1  ;;  %v519_v54 = vpop.f32.mrb[11].mxu0 }
  0xfa   : > { %870 = vst.msk [vmem:[%s1355_s8 + $0x50] sm:$0xf] %vm849_vm3, %v1098_v37  ;;  %857 = vst.msk [vmem:[%s1355_s8 + $0x1c] sm:$0xf] %vm849_vm3, %v1085_v38  ;;  %v1099_v49 = vpack.c.bf16 %v710_v39, %v710_v39  ;;  %v642_v51 = vmul.f32 %v1330_v22, %v580_v47  ;;  %v629_v52 = vmul.f32 %v1143_v48, %v1330_v22  ;;  %v583_v59 = vpop.f32.mrb[11].mxu1 }
  0xfb   : > { %873 = vst.msk [vmem:[%s1355_s8 + $0x5c] sm:$0xf] %vm849_vm3, %v1101_v43  ;;  %855 = vst.msk [vmem:[%s1355_s8 + $0x14] sm:$0xf] %vm849_vm3, %v1083_v44  ;;  %v683_v55 = vadd.f32 %v1335_v24, %v644_v45  ;;  %v665_v56 = vadd.f32 %v1335_v24, %v626_v46  ;;  %v645_v57 = vmul.f32 %v1159_v53, %v1330_v22  ;;  %v699_v60 = vmax.f32 %v667_v50, 0.0 }
  0xfc   : > { %v627_v58 = vmul.f32 %v1330_v22, %v519_v54  ;;  %871 = vst.msk [vmem:[%s1355_s8 + $0x54] sm:$0xf] %vm849_vm3, %v1099_v49  ;;  %v681_v61 = vadd.f32 %v1335_v24, %v642_v51  ;;  %v668_v62 = vadd.f32 %v1335_v24, %v629_v52  ;;  %v643_v63 = vmul.f32 %v1330_v22, %v583_v59 }
  0xfd   : > { %v715_v0 = vmax.f32 %v683_v55, 0.0  ;;  %v697_v1 = vmax.f32 %v665_v56, 0.0  ;;  %v684_v2 = vadd.f32 %v1335_v24, %v645_v57  ;;  %v1088_v4 = vpack.c.bf16 %v699_v60, %v699_v60 }
  0xfe   : > { %v666_v3 = vadd.f32 %v1335_v24, %v627_v58  ;;  %v713_v5 = vmax.f32 %v681_v61, 0.0  ;;  %v700_v6 = vmax.f32 %v668_v62, 0.0  ;;  %v682_v7 = vadd.f32 %v1335_v24, %v643_v63  ;;  %v1146_v12 = vpop.f32.mrb[12].mxu0 }
  0xff   : > { %v1104_v8 = vpack.c.bf16 %v715_v0, %v715_v0  ;;  %v1086_v9 = vpack.c.bf16 %v697_v1, %v697_v1  ;;  %v716_v10 = vmax.f32 %v684_v2, 0.0  ;;  %860 = vst.msk [vmem:[%s1355_s8 + $0x28] sm:$0xf] %vm849_vm3, %v1088_v4  ;;  %v632_v16 = vmul.f32 %v1146_v12, %v1330_v22  ;;  %v1162_v17 = vpop.f32.mrb[12].mxu1  ;;  %v532_v18 = vpop.f32.mrb[13].mxu0 }
 0x100   : > { %v698_v11 = vmax.f32 %v666_v3, 0.0  ;;  %v1102_v13 = vpack.c.bf16 %v713_v5, %v713_v5  ;;  %v1089_v14 = vpack.c.bf16 %v700_v6, %v700_v6  ;;  %v714_v15 = vmax.f32 %v682_v7, 0.0  ;;  %v596_v25 = vpop.f32.mrb[13].mxu1  ;;  %v1147_v26 = vpop.f32.mrb[14].mxu0 }
 0x101   : > { %876 = vst.msk [vmem:[%s1355_s8 + $0x68] sm:$0xf] %vm849_vm3, %v1104_v8  ;;  %858 = vst.msk [vmem:[%s1355_s8 + $0x20] sm:$0xf] %vm849_vm3, %v1086_v9  ;;  %v1105_v19 = vpack.c.bf16 %v716_v10, %v716_v10  ;;  %v648_v21 = vmul.f32 %v1162_v17, %v1330_v22  ;;  %v630_v23 = vmul.f32 %v1330_v22, %v532_v18  ;;  %v1163_v31 = vpop.f32.mrb[14].mxu1  ;;  %v535_v32 = vpop.f32.mrb[15].mxu0 }
 0x102   : > { %v1087_v20 = vpack.c.bf16 %v698_v11, %v698_v11  ;;  %874 = vst.msk [vmem:[%s1355_s8 + $0x60] sm:$0xf] %vm849_vm3, %v1102_v13  ;;  %861 = vst.msk [vmem:[%s1355_s8 + $0x2c] sm:$0xf] %vm849_vm3, %v1089_v14  ;;  %v1103_v27 = vpack.c.bf16 %v714_v15, %v714_v15  ;;  %v671_v28 = vadd.f32 %v1335_v24, %v632_v16  ;;  %v599_v37 = vpop.f32.mrb[15].mxu1 }
 0x103   : > { %v646_v29 = vmul.f32 %v1330_v22, %v596_v25  ;;  %v633_v30 = vmul.f32 %v1147_v26, %v1330_v22  ;;  %877 = vst.msk [vmem:[%s1355_s8 + $0x6c] sm:$0xf] %vm849_vm3, %v1105_v19  ;;  %v687_v33 = vadd.f32 %v1335_v24, %v648_v21  ;;  %v669_v34 = vadd.f32 %v1335_v24, %v630_v23 }
 0x104   : > { %859 = vst.msk [vmem:[%s1355_s8 + $0x24] sm:$0xf] %vm849_vm3, %v1087_v20  ;;  %v649_v35 = vmul.f32 %v1163_v31, %v1330_v22  ;;  %v631_v36 = vmul.f32 %v1330_v22, %v535_v32  ;;  %875 = vst.msk [vmem:[%s1355_s8 + $0x64] sm:$0xf] %vm849_vm3, %v1103_v27  ;;  %v703_v38 = vmax.f32 %v671_v28, 0.0  ;;  %v647_v41 = vmul.f32 %v1330_v22, %v599_v37 }
 0x105   : > { %v685_v39 = vadd.f32 %v1335_v24, %v646_v29  ;;  %v672_v40 = vadd.f32 %v1335_v24, %v633_v30  ;;  %v719_v42 = vmax.f32 %v687_v33, 0.0  ;;  %v701_v43 = vmax.f32 %v669_v34, 0.0 }
 0x106   : > { %v688_v44 = vadd.f32 %v1335_v24, %v649_v35  ;;  %v670_v45 = vadd.f32 %v1335_v24, %v631_v36  ;;  %v1092_v46 = vpack.c.bf16 %v703_v38, %v703_v38  ;;  %v686_v49 = vadd.f32 %v1335_v24, %v647_v41 }
 0x107   : > { %v717_v47 = vmax.f32 %v685_v39, 0.0  ;;  %v704_v48 = vmax.f32 %v672_v40, 0.0  ;;  %v1108_v50 = vpack.c.bf16 %v719_v42, %v719_v42  ;;  %v1090_v51 = vpack.c.bf16 %v701_v43, %v701_v43 }
 0x108   : > { %v720_v22 = vmax.f32 %v688_v44, 0.0  ;;  %v702_v52 = vmax.f32 %v670_v45, 0.0  ;;  %864 = vst.msk [vmem:[%s1355_s8 + $0x38] sm:$0xf] %vm849_vm3, %v1092_v46  ;;  %v718_v55 = vmax.f32 %v686_v49, 0.0 }
 0x109   : > { %v1106_v53 = vpack.c.bf16 %v717_v47, %v717_v47  ;;  %v1093_v54 = vpack.c.bf16 %v704_v48, %v704_v48  ;;  %880 = vst.msk [vmem:[%s1355_s8 + $0x78] sm:$0xf] %vm849_vm3, %v1108_v50  ;;  %862 = vst.msk [vmem:[%s1355_s8 + $0x30] sm:$0xf] %vm849_vm3, %v1090_v51 }
 0x10a   : > { %v1109_v56 = vpack.c.bf16 %v720_v22, %v720_v22  ;;  %v1091_v57 = vpack.c.bf16 %v702_v52, %v702_v52  ;;  %v1107_v24 = vpack.c.bf16 %v718_v55, %v718_v55 }
 0x10b   : > { %878 = vst.msk [vmem:[%s1355_s8 + $0x70] sm:$0xf] %vm849_vm3, %v1106_v53  ;;  %865 = vst.msk [vmem:[%s1355_s8 + $0x3c] sm:$0xf] %vm849_vm3, %v1093_v54 }
 0x10c   : > { %881 = vst.msk [vmem:[%s1355_s8 + $0x7c] sm:$0xf] %vm849_vm3, %v1109_v56  ;;  %863 = vst.msk [vmem:[%s1355_s8 + $0x34] sm:$0xf] %vm849_vm3, %v1091_v57 }
 0x10d   : > { %879 = vst.msk [vmem:[%s1355_s8 + $0x74] sm:$0xf] %vm849_vm3, %v1107_v24 }
 0x10e PF: > { %s14_s17 = sadd.s32 1, %s1233_s17   ;;  %s1486_s15 = smov %s1229_s16 }
 0x10f   : > { %p11_p5 = scmp.ge.s32.totalorder %s14_s17, 4   ;;  %s1487_s16 = smov %s1489_s18 }
 0x111   :  { %13 = sbr.rel (!%p11_p5) target bundleno = 2 (0x2), region = 75 }

</bundles_post_ra>
